<compile_context>
chip_gen: v7x
topology: tpu7x:2x2x1
jax: 0.10.0
libtpu: 0.0.40
codegen_flags: <defaults>
</compile_context>

<pallas_src>
import jax
import jax.numpy as jnp
from jax.experimental import pallas as pl
from jax.experimental.pallas import tpu as pltpu

N_STATES = 4      # CartPole observation_space.shape[0]
N_ACTIONS = 2     # CartPole action_space.n
HIDDEN = 50

HIDDEN_PAD = 128  # hidden width zero-padded to a full lane/MXU dimension
ACT_PAD = 8       # actions zero-padded to one f32 sublane group


def dqn_kernel(xT_ref, w1_ref, b1_ref, w2_ref, b2_ref, oT_ref):
    # fc1 + ReLU, transposed: (HIDDEN_PAD, N_STATES) @ (N_STATES, Bt) + (HIDDEN_PAD, 1)
    h = jnp.maximum(
        jnp.dot(w1_ref[...], xT_ref[...], preferred_element_type=jnp.float32)
        + b1_ref[...],
        0.0,
    )
    # out, transposed: (ACT_PAD, HIDDEN_PAD) @ (HIDDEN_PAD, Bt) + (ACT_PAD, 1)
    oT_ref[...] = (
        jnp.dot(w2_ref[...], h, preferred_element_type=jnp.float32) + b2_ref[...]
    ).astype(oT_ref.dtype)


def pad_params(w1, b1, w2, b2):
    """Zero-pad params (PyTorch layout) to hardware-friendly widths, once.

    w1: (HIDDEN, N_STATES)   b1: (HIDDEN,)
    w2: (N_ACTIONS, HIDDEN)  b2: (N_ACTIONS,)
    """
    w1p = jnp.zeros((HIDDEN_PAD, N_STATES), jnp.float32).at[:HIDDEN, :].set(w1)
    b1p = jnp.zeros((HIDDEN_PAD, 1), jnp.float32).at[:HIDDEN, 0].set(
        jnp.reshape(b1, (HIDDEN,)))
    w2p = jnp.zeros((ACT_PAD, HIDDEN_PAD), jnp.float32).at[:N_ACTIONS, :HIDDEN].set(w2)
    b2p = jnp.zeros((ACT_PAD, 1), jnp.float32).at[:N_ACTIONS, 0].set(
        jnp.reshape(b2, (N_ACTIONS,)))
    return w1p, b1p, w2p, b2p


def dqn_forward_t(xT, w1p, b1p, w2p, b2p, *, num_blocks=1):
    """Core kernel entry. xT: (N_STATES, B) f32. Returns (N_ACTIONS, B) f32.

    num_blocks=1 (default): single whole-array block, no grid. Use for any
    batch up to ~16K rows on all generations.
    num_blocks=2: split the batch across a 2-step "parallel" grid (v7x: one
    big block per TensorCore). Weights stay VMEM-resident across steps.
    """
    B = xT.shape[1]

    if num_blocks <= 1:
        # No grid, no pipeline machinery, no padding copies of x.
        oT = pl.pallas_call(
            dqn_kernel,
            out_shape=jax.ShapeDtypeStruct((ACT_PAD, B), jnp.float32),
            in_specs=[pl.BlockSpec(memory_space=pltpu.MemorySpace.VMEM)] * 5,
            out_specs=pl.BlockSpec(memory_space=pltpu.MemorySpace.VMEM),
        )(xT, w1p, b1p, w2p, b2p)
        return oT[:N_ACTIONS, :]

    # Multi-block path: tile only the batch (lane) axis into num_blocks blocks.
    block_b = max(128, ((pl.cdiv(B, num_blocks) + 127) // 128) * 128)
    Bp = num_blocks * block_b
    if Bp != B:
        xT = jnp.pad(xT, ((0, 0), (0, Bp - B)))
    oT = pl.pallas_call(
        dqn_kernel,
        out_shape=jax.ShapeDtypeStruct((ACT_PAD, Bp), jnp.float32),
        grid=(num_blocks,),
        in_specs=[
            pl.BlockSpec((N_STATES, block_b), lambda i: (0, i)),
            pl.BlockSpec((HIDDEN_PAD, N_STATES), lambda i: (0, 0)),
            pl.BlockSpec((HIDDEN_PAD, 1), lambda i: (0, 0)),
            pl.BlockSpec((ACT_PAD, HIDDEN_PAD), lambda i: (0, 0)),
            pl.BlockSpec((ACT_PAD, 1), lambda i: (0, 0)),
        ],
        out_specs=pl.BlockSpec((ACT_PAD, block_b), lambda i: (0, i)),
        compiler_params=pltpu.CompilerParams(
            dimension_semantics=("parallel",)),
    )(xT, w1p, b1p, w2p, b2p)
    return oT[:N_ACTIONS, :B]


def dqn_forward(x, w1p, b1p, w2p, b2p, *, num_blocks=1):
    """Convenience wrapper matching Net.forward: x (B, N_STATES) -> (B, N_ACTIONS).

    A replay buffer that already stores observations transposed should call
    dqn_forward_t directly and skip these two tiny transposes.
    """
    oT = dqn_forward_t(jnp.transpose(x), w1p, b1p, w2p, b2p, num_blocks=num_blocks)
    return jnp.transpose(oT)


def init_params(key):
    """Deterministic synthetic init mirroring the PyTorch module (PyTorch layout):
    weights ~ Normal(0, 0.1); biases use nn.Linear's default U(-1/sqrt(fan_in), +)."""
    k1, k2, k3, k4 = jax.random.split(key, 4)
    w1 = 0.1 * jax.random.normal(k1, (HIDDEN, N_STATES), jnp.float32)
    w2 = 0.1 * jax.random.normal(k2, (N_ACTIONS, HIDDEN), jnp.float32)
    bound1 = 1.0 / jnp.sqrt(jnp.float32(N_STATES))
    bound2 = 1.0 / jnp.sqrt(jnp.float32(HIDDEN))
    b1 = jax.random.uniform(k3, (HIDDEN,), jnp.float32, -bound1, bound1)
    b2 = jax.random.uniform(k4, (N_ACTIONS,), jnp.float32, -bound2, bound2)
    return w1, b1, w2, b2


def _reference(x, w1, b1, w2, b2):
    return jnp.maximum(x @ w1.T + b1, 0.0) @ w2.T + b2


if __name__ == "__main__":
    key = jax.random.PRNGKey(0)
    kx, kp, kx2 = jax.random.split(key, 3)

    w1, b1, w2, b2 = init_params(kp)
    w1p, b1p, w2p, b2p = pad_params(w1, b1, w2, b2)

    # Small batch (agent acting): single whole-array block, no grid, no pads.
    batch = 2
    x = jax.random.normal(kx, (batch, N_STATES), jnp.float32)
    actions_value = dqn_forward(x, w1p, b1p, w2p, b2p)
    jax.block_until_ready(actions_value)
    assert actions_value.shape == (batch, N_ACTIONS)
    assert jnp.allclose(actions_value, _reference(x, w1, b1, w2, b2),
                        atol=1e-5, rtol=1e-5)

    # Replay-buffer learning batch: still the no-grid path by default.
    batch2 = 512
    x2 = jax.random.normal(kx2, (batch2, N_STATES), jnp.float32)
    q2 = dqn_forward(x2, w1p, b1p, w2p, b2p)
    jax.block_until_ready(q2)
    assert q2.shape == (batch2, N_ACTIONS)
    ref2 = _reference(x2, w1, b1, w2, b2)
    assert jnp.allclose(q2, ref2, atol=1e-5, rtol=1e-5)

    # v7x-style split: exactly 2 big blocks, one per TensorCore.
    q2_mc = dqn_forward(x2, w1p, b1p, w2p, b2p, num_blocks=2)
    jax.block_until_ready(q2_mc)
    assert q2_mc.shape == (batch2, N_ACTIONS)
    assert jnp.allclose(q2_mc, ref2, atol=1e-5, rtol=1e-5)

    print("KERNEL_OK")
</pallas_src>

<mosaic_0001>
module attributes {stable_mosaic.version = 11 : i64} {
  func.func @dqn_kernel(%arg0: memref<4x2xf32, #tpu.memory_space<vmem>>, %arg1: memref<128x4xf32, #tpu.memory_space<vmem>>, %arg2: memref<128x1xf32, #tpu.memory_space<vmem>>, %arg3: memref<8x128xf32, #tpu.memory_space<vmem>>, %arg4: memref<8x1xf32, #tpu.memory_space<vmem>>, %arg5: memref<8x2xf32, #tpu.memory_space<vmem>>) attributes {dimension_semantics = [], scalar_prefetch = 0 : i64, scratch_operands = 0 : i64, tpu.core_type = #tpu.core_type<tc>} {
    %c0 = arith.constant 0 : index
    %c0_0 = arith.constant 0 : index
    %0 = vector.load %arg1[%c0, %c0_0] : memref<128x4xf32, #tpu.memory_space<vmem>>, vector<128x4xf32>
    %c0_1 = arith.constant 0 : index
    %c0_2 = arith.constant 0 : index
    %1 = vector.load %arg0[%c0_1, %c0_2] : memref<4x2xf32, #tpu.memory_space<vmem>>, vector<4x2xf32>
    %cst = arith.constant dense<0.000000e+00> : vector<128x2xf32>
    %2 = tpu.matmul %0, %1, %cst {dimension_numbers = #tpu.dot_dimension_numbers<[1], [0], [0], [1], [0, 0, 1, 1], [], []>} : vector<128x4xf32>, vector<4x2xf32>, vector<128x2xf32> -> vector<128x2xf32>
    %c0_3 = arith.constant 0 : index
    %c0_4 = arith.constant 0 : index
    %3 = vector.load %arg2[%c0_3, %c0_4] : memref<128x1xf32, #tpu.memory_space<vmem>>, vector<128x1xf32>
    %4 = vector.broadcast %3 : vector<128x1xf32> to vector<128x2xf32>
    %5 = arith.addf %2, %4 : vector<128x2xf32>
    %cst_5 = arith.constant 0.000000e+00 : f32
    %6 = vector.broadcast %cst_5 : f32 to vector<128x2xf32>
    %7 = arith.maximumf %5, %6 : vector<128x2xf32>
    %c0_6 = arith.constant 0 : index
    %c0_7 = arith.constant 0 : index
    %8 = vector.load %arg3[%c0_6, %c0_7] : memref<8x128xf32, #tpu.memory_space<vmem>>, vector<8x128xf32>
    %cst_8 = arith.constant dense<0.000000e+00> : vector<8x2xf32>
    %9 = tpu.matmul %8, %7, %cst_8 {dimension_numbers = #tpu.dot_dimension_numbers<[1], [0], [0], [1], [0, 0, 1, 1], [], []>} : vector<8x128xf32>, vector<128x2xf32>, vector<8x2xf32> -> vector<8x2xf32>
    %c0_9 = arith.constant 0 : index
    %c0_10 = arith.constant 0 : index
    %10 = vector.load %arg4[%c0_9, %c0_10] : memref<8x1xf32, #tpu.memory_space<vmem>>, vector<8x1xf32>
    %11 = vector.broadcast %10 : vector<8x1xf32> to vector<8x2xf32>
    %12 = arith.addf %9, %11 : vector<8x2xf32>
    %c0_11 = arith.constant 0 : index
    %c0_12 = arith.constant 0 : index
    %13 = vector.load %arg5[%c0_11, %c0_12] : memref<8x2xf32, #tpu.memory_space<vmem>>, vector<8x2xf32>
    tpu.vector_store %arg5[%c0_11, %c0_12], %12 {strides = array<i32>} : memref<8x2xf32, #tpu.memory_space<vmem>>, vector<8x2xf32>,
    return
  }
}

</mosaic_0001>

<bundles_post_ra>
// kernel: tpu_custom_call.1
= control target key start
LH: loop header
LB: loop body
LE: loop exit
PB: predicated region body
PF: predicated region fallthrough
CT: control target
= control target key end

     0   :  { %vm182_vm0 = vcmask 1043456   ;;  %vm133_vm1 = vcmask 31744   ;;  %v572_v3 = vmov 0   ;;  %v573_v35 = vmov 0.0|0.0   ;;  %s738_s0 = inlined_call_operand.vmem [shape: f32[4,2], index: 0, kind: input, shape index: {}]   ;;  %s739_s1 = inlined_call_operand.vmem [shape: f32[128,4], index: 1, kind: input, shape index: {}]   ;;  %s740_s2 = inlined_call_operand.vmem [shape: f32[128,1], index: 2, kind: input, shape index: {}]   ;;  %s741_s4 = inlined_call_operand.vmem [shape: f32[8,1], index: 4, kind: input, shape index: {}]   ;;  %s742_s3 = inlined_call_operand.vmem [shape: f32[8,128], index: 3, kind: input, shape index: {}]   ;;  %s743_s5 = inlined_call_operand.vmem [shape: f32[8,2], index: 5, kind: output, shape index: {}]  }
   0x1   :  { %v36_v0 = vld [vmem:[%s738_s0] sm:$0xf]  ;;  %v21_v2 = vld [vmem:[%s739_s1 + $0x8] sm:$0xff]  ;;  %570 = vset.pattern.permute.xlu0 %v572_v3  ;;  %571 = vset.pattern.permute.xlu1 %v572_v3  ;;  %v22_v4 = vld [vmem:[%s739_s1 + $0x10] sm:$0xff]  ;;  %vm574_vm2 = vmmov 0   ;;  %v575_v36 = vmov 0.0  }
   0x2   :  { %v20_v1 = vld [vmem:[%s739_s1] sm:$0xff]  ;;  %481 = vmatprep.subr.msk.mxu0 %vm182_vm0, %v36_v0  ;;  %v23_v5 = vld [vmem:[%s739_s1 + $0x18] sm:$0xff]  ;;  %v39_v8 = vld [vmem:[%s740_s2 + $0x10] sm:$0xff]  ;;  %542 = vmatprep.subr.bf16.mxu1 %v573_v35  ;;  %vm424_vm3 = vcmask 15360  }
   0x3   :  { %483 = vmatprep.mubr.msk.f32.mxu0 %vm133_vm1, %v20_v1  ;;  %482 = vmatpush3.msk.msra.mxu0 %vm182_vm0, %v36_v0  ;;  %v24_v6 = vld [vmem:[%s739_s1 + $0x20] sm:$0xff]  ;;  %v38_v9 = vld [vmem:[%s740_s2 + $0x8] sm:$0xff]  ;;  %v40_v11 = vld [vmem:[%s740_s2 + $0x18] sm:$0xff] }
   0x4   :  { %484 = vmatmul.mubr.msk.f32.vlgmr.msra.gmra.mrb[0].mxu0 %vm133_vm1, %v21_v2  ;;  %v37_v7 = vld [vmem:[%s740_s2] sm:$0xff]  ;;  %65 = vperm.xlu1 %571, %v39_v8   ;;  %v25_v10 = vld [vmem:[%s739_s1 + $0x28] sm:$0xff]  ;;  %v26_v12 = vld [vmem:[%s739_s1 + $0x30] sm:$0xff] }
   0x5   :  { %486 = vmatprep.mubr.msk.f32.mxu0 %vm133_vm1, %v22_v4  ;;  %55 = vperm.xlu0 %570, %v37_v7   ;;  %v41_v13 = vld [vmem:[%s740_s2 + $0x20] sm:$0xff]  ;;  %v27_v14 = vld [vmem:[%s739_s1 + $0x38] sm:$0xff]  ;;  %v42_v15 = vld [vmem:[%s740_s2 + $0x28] sm:$0xff] }
   0x6   :  { %v28_v16 = vld [vmem:[%s739_s1 + $0x40] sm:$0xff]  ;;  %v43_v17 = vld [vmem:[%s740_s2 + $0x30] sm:$0xff]  ;;  %v29_v18 = vld [vmem:[%s739_s1 + $0x48] sm:$0xff]  ;;  %539 = vmatprep.mubr.msk.f32.mxu1 %vm574_vm2, %v575_v36 }
   0x7   :  { %v44_v19 = vld [vmem:[%s740_s2 + $0x38] sm:$0xff]  ;;  %v30_v20 = vld [vmem:[%s739_s1 + $0x50] sm:$0xff]  ;;  %v45_v21 = vld [vmem:[%s740_s2 + $0x40] sm:$0xff] }
   0x8   :  { %487 = vmatmul.mubr.msk.f32.gmra.mrb[2].mxu0 %vm133_vm1, %v23_v5  ;;  %70 = vperm.xlu1 %571, %v40_v11   ;;  %v31_v22 = vld [vmem:[%s739_s1 + $0x58] sm:$0xff]  ;;  %v46_v23 = vld [vmem:[%s740_s2 + $0x48] sm:$0xff]  ;;  %v32_v24 = vld [vmem:[%s739_s1 + $0x60] sm:$0xff] }
   0x9   :  { %489 = vmatprep.mubr.msk.f32.mxu0 %vm133_vm1, %v24_v6  ;;  %60 = vperm.xlu0 %570, %v38_v9   ;;  %v47_v25 = vld [vmem:[%s740_s2 + $0x50] sm:$0xff]  ;;  %v33_v26 = vld [vmem:[%s739_s1 + $0x68] sm:$0xff]  ;;  %v48_v27 = vld [vmem:[%s740_s2 + $0x58] sm:$0xff] }
   0xa   :  { %v34_v28 = vld [vmem:[%s739_s1 + $0x70] sm:$0xff]  ;;  %v49_v29 = vld [vmem:[%s740_s2 + $0x60] sm:$0xff]  ;;  %v35_v30 = vld [vmem:[%s739_s1 + $0x78] sm:$0xff] }
   0xb   :  { %v50_v31 = vld [vmem:[%s740_s2 + $0x68] sm:$0xff]  ;;  %v51_v32 = vld [vmem:[%s740_s2 + $0x70] sm:$0xff]  ;;  %v52_v33 = vld [vmem:[%s740_s2 + $0x78] sm:$0xff] }
   0xc   :  { %490 = vmatmul.mubr.msk.f32.gmra.mrb[4].mxu0 %vm133_vm1, %v25_v10  ;;  %80 = vperm.xlu1 %571, %v42_v15   ;;  %v348_v34 = vld [vmem:[%s741_s4] sm:$0xff] }
   0xd   :  { %492 = vmatprep.mubr.msk.f32.mxu0 %vm133_vm1, %v26_v12  ;;  %75 = vperm.xlu0 %570, %v41_v13  }
  0x10   :  { %493 = vmatmul.mubr.msk.f32.gmra.mrb[6].mxu0 %vm133_vm1, %v27_v14  ;;  %90 = vperm.xlu1 %571, %v44_v19  }
  0x11   :  { %495 = vmatprep.mubr.msk.f32.mxu0 %vm133_vm1, %v28_v16  ;;  %85 = vperm.xlu0 %570, %v43_v17  }
  0x14   :  { %496 = vmatmul.mubr.msk.f32.gmra.mrb[8].mxu0 %vm133_vm1, %v29_v18  ;;  %100 = vperm.xlu1 %571, %v46_v23  }
  0x15   :  { %498 = vmatprep.mubr.msk.f32.mxu0 %vm133_vm1, %v30_v20  ;;  %95 = vperm.xlu0 %570, %v45_v21  }
  0x18   :  { %499 = vmatmul.mubr.msk.f32.gmra.mrb[10].mxu0 %vm133_vm1, %v31_v22  ;;  %110 = vperm.xlu1 %571, %v48_v27  }
  0x19   :  { %501 = vmatprep.mubr.msk.f32.mxu0 %vm133_vm1, %v32_v24  ;;  %105 = vperm.xlu0 %570, %v47_v25  }
  0x1c   :  { %502 = vmatmul.mubr.msk.f32.gmra.mrb[12].mxu0 %vm133_vm1, %v33_v26  ;;  %120 = vperm.xlu1 %571, %v50_v31  }
  0x1d   :  { %504 = vmatprep.mubr.msk.f32.mxu0 %vm133_vm1, %v34_v28  ;;  %115 = vperm.xlu0 %570, %v49_v29  }
  0x20   :  { %505 = vmatmul.mubr.msk.f32.gmra.mrb[14].mxu0 %vm133_vm1, %v35_v30  ;;  %130 = vperm.xlu1 %571, %v52_v33  }
  0x21   :  { %125 = vperm.xlu0 %570, %v51_v32  }
  0x25   :  { %351 = vperm.xlu0 %570, %v348_v34  }
  0x83   :  { %v66_v37 = vpop.permute.xlu1 %65 }
  0x84   :  { %v56_v38 = vpop.permute.xlu0 %55 }
  0x87   :  { %v71_v39 = vpop.permute.xlu1 %70 }
  0x88   :  { %v61_v40 = vpop.permute.xlu0 %60 }
  0x8b   :  { %v81_v41 = vpop.permute.xlu1 %80 }
  0x8c   :  { %v76_v42 = vpop.permute.xlu0 %75 }
  0x8f   :  { %v91_v48 = vpop.permute.xlu1 %90 }
  0x90   :  { %v86_v51 = vpop.permute.xlu0 %85 }
  0x93   :  { %v101_v61 = vpop.permute.xlu1 %100 }
  0x94   :  { %v96_v0 = vpop.permute.xlu0 %95 }
  0x97   :  { %v111_v9 = vpop.permute.xlu1 %110 }
  0x98   :  { %v106_v12 = vpop.permute.xlu0 %105 }
  0x9b   :  { %v121_v22 = vpop.permute.xlu1 %120 }
  0x9c   :  { %v116_v25 = vpop.permute.xlu0 %115 }
  0x9f   :  { %v131_v34 = vpop.permute.xlu1 %130 }
  0xd7   :  { %v485_v43 = vpop.f32.mrb[0].mxu0 }
  0xd8   :  { %v258_v44 = vadd.f32 %v485_v43, %v61_v40  ;;  %v252_v45 = vpop.f32.mrb[1].mxu0 }
  0xd9   :  { %v253_v46 = vadd.f32 %v252_v45, %v56_v38  ;;  %v126_v38 = vpop.permute.xlu0 %125 }
  0xda   :  { %v332_v47 = vmax.f32 %v258_v44, 0.0 }
  0xdb   :  { %v331_v49 = vmax.f32 %v253_v46, 0.0  ;;  %v488_v50 = vpop.f32.mrb[2].mxu0  ;;  %v347_v46 = vld [vmem:[%s742_s3] sm:$0xff] }
  0xdc   :  { %v268_v52 = vadd.f32 %v488_v50, %v71_v39  ;;  %v262_v53 = vpop.f32.mrb[3].mxu0 }
  0xdd   :  { %v263_v54 = vadd.f32 %v262_v53, %v66_v37  ;;  %v543_v55 = vpack.c.bf16 %v332_v47, %v331_v49  ;;  %v352_v47 = vpop.permute.xlu0 %351 }
  0xde   :  { %v334_v56 = vmax.f32 %v268_v52, 0.0 }
  0xdf   :  { %v333_v57 = vmax.f32 %v263_v54, 0.0  ;;  %v491_v58 = vpop.f32.mrb[4].mxu0  ;;  %544 = vmatpush3.bf16.msra.mxu1 %v543_v55 }
  0xe0   :  { %v278_v59 = vadd.f32 %v491_v58, %v81_v41  ;;  %v272_v60 = vpop.f32.mrb[5].mxu0  ;;  %545 = vmatprep.subr.bf16.mxu1 %v573_v35 }
  0xe1   :  { %v546_v62 = vpack.c.bf16 %v334_v56, %v333_v57  ;;  %v273_v63 = vadd.f32 %v272_v60, %v76_v42 }
  0xe2   :  { %v336_v1 = vmax.f32 %v278_v59, 0.0 }
  0xe3   :  { %v335_v2 = vmax.f32 %v273_v63, 0.0  ;;  %v494_v3 = vpop.f32.mrb[6].mxu0  ;;  %547 = vmatpush3.bf16.msra.mxu1 %v546_v62 }
  0xe4   :  { %v288_v4 = vadd.f32 %v494_v3, %v91_v48  ;;  %v282_v5 = vpop.f32.mrb[7].mxu0  ;;  %548 = vmatprep.subr.bf16.mxu1 %v573_v35 }
  0xe5   :  { %v549_v6 = vpack.c.bf16 %v336_v1, %v335_v2  ;;  %v283_v7 = vadd.f32 %v282_v5, %v86_v51 }
  0xe6   :  { %v338_v8 = vmax.f32 %v288_v4, 0.0 }
  0xe7   :  { %v337_v10 = vmax.f32 %v283_v7, 0.0  ;;  %v497_v11 = vpop.f32.mrb[8].mxu0  ;;  %550 = vmatpush3.bf16.msra.mxu1 %v549_v6 }
  0xe8   :  { %v298_v13 = vadd.f32 %v497_v11, %v101_v61  ;;  %v292_v14 = vpop.f32.mrb[9].mxu0  ;;  %551 = vmatprep.subr.bf16.mxu1 %v573_v35 }
  0xe9   :  { %v552_v15 = vpack.c.bf16 %v338_v8, %v337_v10  ;;  %v293_v16 = vadd.f32 %v292_v14, %v96_v0 }
  0xea   :  { %v340_v17 = vmax.f32 %v298_v13, 0.0 }
  0xeb   :  { %v339_v18 = vmax.f32 %v293_v16, 0.0  ;;  %v500_v19 = vpop.f32.mrb[10].mxu0  ;;  %553 = vmatpush3.bf16.msra.mxu1 %v552_v15 }
  0xec   :  { %v308_v20 = vadd.f32 %v500_v19, %v111_v9  ;;  %v302_v21 = vpop.f32.mrb[11].mxu0  ;;  %554 = vmatprep.subr.bf16.mxu1 %v573_v35 }
  0xed   :  { %v555_v23 = vpack.c.bf16 %v340_v17, %v339_v18  ;;  %v303_v24 = vadd.f32 %v302_v21, %v106_v12 }
  0xee   :  { %v342_v26 = vmax.f32 %v308_v20, 0.0 }
  0xef   :  { %v341_v27 = vmax.f32 %v303_v24, 0.0  ;;  %v503_v28 = vpop.f32.mrb[12].mxu0  ;;  %556 = vmatpush3.bf16.msra.mxu1 %v555_v23 }
  0xf0   :  { %v318_v29 = vadd.f32 %v503_v28, %v121_v22  ;;  %v312_v30 = vpop.f32.mrb[13].mxu0  ;;  %557 = vmatprep.subr.bf16.mxu1 %v573_v35 }
  0xf1   :  { %v558_v31 = vpack.c.bf16 %v342_v26, %v341_v27  ;;  %v313_v32 = vadd.f32 %v312_v30, %v116_v25 }
  0xf2   :  { %v344_v33 = vmax.f32 %v318_v29, 0.0 }
  0xf3   :  { %v343_v36 = vmax.f32 %v313_v32, 0.0  ;;  %v506_v37 = vpop.f32.mrb[14].mxu0  ;;  %559 = vmatpush3.bf16.msra.mxu1 %v558_v31 }
  0xf4   :  { %v328_v39 = vadd.f32 %v506_v37, %v131_v34  ;;  %v322_v40 = vpop.f32.mrb[15].mxu0  ;;  %560 = vmatprep.subr.bf16.mxu1 %v573_v35 }
  0xf5   :  { %v561_v41 = vpack.c.bf16 %v344_v33, %v343_v36  ;;  %v323_v42 = vadd.f32 %v322_v40, %v126_v38 }
  0xf6   :  { %v346_v43 = vmax.f32 %v328_v39, 0.0 }
  0xf7   :  { %v345_v44 = vmax.f32 %v323_v42, 0.0  ;;  %562 = vmatpush3.bf16.msra.mxu1 %v561_v41 }
  0xf8   :  { %563 = vmatprep.subr.bf16.mxu1 %v573_v35 }
  0xf9   :  { %v564_v45 = vpack.c.bf16 %v346_v43, %v345_v44 }
  0xfb   :  { %565 = vmatpush3.bf16.msra.mxu1 %v564_v45 }
  0xfe   :  { %540 = vmatmul.mubr.f32.vlgmr.msra.gmra.mrb[0].mxu1 %v347_v46 }
 0x1d1   :  { %v420_v48 = vpop.f32.mrb[0].mxu1 }
 0x1d2   :  { %v421_v49 = vadd.f32 %v420_v48, %v352_v47  ;;  %v541_v50 = vpop.f32.mrb[1].mxu1 }
 0x1d4   :  { %425 = vst.msk [vmem:[%s743_s5] sm:$0xff] %vm424_vm3, %v421_v49 }

</bundles_post_ra>
